<compile_context>
chip_gen: v7x
topology: tpu7x:2x2x1
jax: 0.10.0
libtpu: 0.0.40
codegen_flags: <defaults>
</compile_context>

<pallas_src>
import functools
import math

import jax
import jax.numpy as jnp
from jax.experimental import pallas as pl
from jax.experimental.pallas import tpu as pltpu

SMOOTH = 1e-6
_SUB = 8      # f32 sublane width
_LANE = 128   # lane width


def _round_up(x, m):
    return ((x + m - 1) // m) * m


def _inert_logit(dtype):
    """Pad value whose sigmoid is (numerically) exactly 0 after f32 upcast."""
    dtype = jnp.dtype(dtype)
    if jnp.issubdtype(dtype, jnp.floating):
        return float(jnp.finfo(dtype).min)
    return int(jnp.iinfo(dtype).min)


def _dice_kernel(o_ref, t_ref, inter_ref, union_ref, *,
                 tile_rows, lanes, rows, k_per_chunk, full_tiles, needs_mask):
    c = pl.program_id(1)
    k = pl.program_id(2)

    # New (b, chunk) output block -> zero the resident accumulators.
    @pl.when(k == 0)
    def _():
        inter_ref[...] = jnp.zeros_like(inter_ref)
        union_ref[...] = jnp.zeros_like(union_ref)

    def accumulate(valid_rows):
        # Compute in f32 regardless of streamed dtype (callers may stream
        # bf16 logits / int8 or bool targets to cut HBM traffic).
        o = jax.nn.sigmoid(o_ref[...].astype(jnp.float32))
        t = t_ref[...].astype(jnp.float32)
        if valid_rows is not None:
            # Row mask for the ragged / overflow tile only.  where-select also
            # kills any garbage (incl. NaN) in the block's overhang region.
            row_id = jax.lax.broadcasted_iota(jnp.int32, (tile_rows, lanes), 0)
            keep = row_id < valid_rows
            o = jnp.where(keep, o, 0.0)
            t = jnp.where(keep, t, 0.0)
        # Fold rows into groups of 8 sublanes and reduce over the *leading*
        # axis: plain VPU adds, no XLU in the hot loop.
        o3 = o.reshape(tile_rows // _SUB, _SUB, lanes)
        t3 = t.reshape(tile_rows // _SUB, _SUB, lanes)
        inter_ref[...] += jnp.sum(o3 * t3, axis=0)
        union_ref[...] += jnp.sum(o3 + t3, axis=0)

    if needs_mask:
        gt = c * k_per_chunk + k        # global row-tile index

        @pl.when(gt < full_tiles)       # full tiles: no mask cost
        def _():
            accumulate(None)

        @pl.when(gt >= full_tiles)      # ragged last tile / overflow tiles
        def _():
            accumulate(rows - gt * tile_rows)
    else:
        accumulate(None)


def dice_loss(outputs, targets, smooth=SMOOTH, reduction="mean"):
    """Pallas TPU implementation of DiceLoss.forward.

    Callers may pass bf16 logits and int8/bool targets directly; the kernel
    upcasts internally (do NOT astype in a wrapper — that adds HBM traffic).
    """
    assert outputs.shape == targets.shape
    B = outputs.shape[0]
    N = math.prod(outputs.shape[1:])

    o2 = outputs.reshape(B, N)
    t2 = targets.reshape(B, N)

    # --- lane-dense zero-copy layout: (B, N) -> (B, rows, lanes) ------------
    n_eff = N
    if N % (_SUB * _LANE) != 0:
        # TODO(synk): replace this whole-array pad with an in-kernel element
        # mask of the ragged tail; only hit when N is not a multiple of 1024.
        n_eff = _round_up(N, _SUB * _LANE)
        pad = n_eff - N
        o2 = jnp.pad(o2, ((0, 0), (0, pad)),
                     constant_values=_inert_logit(o2.dtype))
        t2 = jnp.pad(t2, ((0, 0), (0, pad)), constant_values=0)

    # Largest lane width in {512, 256, 128} keeping rows a multiple of 8.
    lanes = next(c for c in (512, 256, 128) if n_eff % (_SUB * c) == 0)
    rows = n_eff // lanes
    o3 = o2.reshape(B, rows, lanes)
    t3 = t2.reshape(B, rows, lanes)

    # --- row-tile sizing from a VMEM budget ---------------------------------
    # Budget counts double-buffered streamed tiles (2 inputs x 2 buffers) plus
    # ~4 f32-tile-sized in-kernel temporaries, so narrow streamed dtypes don't
    # blow the v7x 32 MiB scoped limit via the f32 upcasts.
    streamed = o3.dtype.itemsize + t3.dtype.itemsize
    per_row = lanes * (2 * streamed + 4 * 4)
    budget = 16 * 1024 * 1024
    tr_cap = max(_SUB, (budget // per_row) // _SUB * _SUB)
    tile_rows = min(tr_cap, rows)               # rows is a multiple of 8

    total_tiles = -(-rows // tile_rows)
    full_tiles = rows // tile_rows

    # v7x has 2 TensorCores: for B == 1 split the row-tile range across a
    # second 'parallel' axis so both cores stream (no-op on v5e/v6e).
    n_chunks = 2 if (B == 1 and total_tiles >= 2) else 1
    k_per_chunk = -(-total_tiles // n_chunks)

    needs_mask = (rows % tile_rows != 0) or (n_chunks * k_per_chunk != total_tiles)

    if n_chunks * k_per_chunk > total_tiles:
        last_blk = total_tiles - 1

        def row_map(b, c, k):
            # Clamp so no out-of-range block DMA; overflow tiles are fully
            # masked in-kernel anyway.
            return (b, jnp.minimum(c * k_per_chunk + k, last_blk), 0)
    else:
        def row_map(b, c, k):
            return (b, c * k_per_chunk + k, 0)

    kernel = functools.partial(
        _dice_kernel, tile_rows=tile_rows, lanes=lanes, rows=rows,
        k_per_chunk=k_per_chunk, full_tiles=full_tiles, needs_mask=needs_mask)

    inter_p, union_p = pl.pallas_call(
        kernel,
        out_shape=(
            jax.ShapeDtypeStruct((B, n_chunks, _SUB, lanes), jnp.float32),
            jax.ShapeDtypeStruct((B, n_chunks, _SUB, lanes), jnp.float32),
        ),
        grid_spec=pltpu.PrefetchScalarGridSpec(
            num_scalar_prefetch=0,
            grid=(B, n_chunks, k_per_chunk),
            in_specs=[
                pl.BlockSpec((None, tile_rows, lanes), row_map),
                pl.BlockSpec((None, tile_rows, lanes), row_map),
            ],
            out_specs=[
                pl.BlockSpec((None, None, _SUB, lanes),
                             lambda b, c, k: (b, c, 0, 0)),
                pl.BlockSpec((None, None, _SUB, lanes),
                             lambda b, c, k: (b, c, 0, 0)),
            ],
        ),
        compiler_params=pltpu.CompilerParams(
            dimension_semantics=("parallel", "parallel", "arbitrary"),
            vmem_limit_bytes=32 * 1024 * 1024,
        ),
    )(o3, t3)

    # Tiny lane-dense partials -> per-sample dice in plain JAX.
    inter = jnp.sum(inter_p, axis=(1, 2, 3))
    union = jnp.sum(union_p, axis=(1, 2, 3))
    dice = (2.0 * inter + smooth) / (union + smooth)
    loss = 1.0 - dice
    if reduction == "mean":
        return jnp.mean(loss)
    if reduction == "sum":
        return jnp.sum(loss)
    return loss


def _dice_loss_ref(outputs, targets, smooth=SMOOTH):
    B = outputs.shape[0]
    o = jax.nn.sigmoid(outputs.astype(jnp.float32)).reshape(B, -1)
    t = targets.astype(jnp.float32).reshape(B, -1)
    inter = jnp.sum(o * t, axis=1)
    union = jnp.sum(o, axis=1) + jnp.sum(t, axis=1)
    dice = (2.0 * inter + smooth) / (union + smooth)
    return jnp.mean(1.0 - dice)


if __name__ == "__main__":
    key = jax.random.PRNGKey(0)
    k1, k2, k3, k4 = jax.random.split(key, 4)

    # Primary case: NCHW-like, N a multiple of 1024 -> zero-copy fast path.
    outputs = jax.random.normal(k1, (2, 4, 16, 16), dtype=jnp.float32)
    targets = (jax.random.uniform(k2, (2, 4, 16, 16)) > 0.5).astype(jnp.float32)
    loss = jax.block_until_ready(dice_loss(outputs, targets))
    ref = jax.block_until_ready(_dice_loss_ref(outputs, targets))
    assert jnp.allclose(loss, ref, atol=1e-5, rtol=1e-5), (loss, ref)

    # Secondary case: ragged N (not a multiple of 1024) -> minimal-pad path.
    outputs2 = jax.random.normal(k3, (2, 3, 20, 20), dtype=jnp.float32)
    targets2 = (jax.random.uniform(k4, (2, 3, 20, 20)) > 0.5).astype(jnp.float32)
    loss2 = jax.block_until_ready(dice_loss(outputs2, targets2))
    ref2 = jax.block_until_ready(_dice_loss_ref(outputs2, targets2))
    assert jnp.allclose(loss2, ref2, atol=1e-5, rtol=1e-5), (loss2, ref2)

    print("KERNEL_OK")
</pallas_src>

<mosaic_0001>
module attributes {stable_mosaic.version = 11 : i64} {
  func.func @_dice_kernel(%arg0: i32, %arg1: i32, %arg2: i32, %arg3: memref<1x8x128xf32, #tpu.memory_space<vmem>>, %arg4: memref<1x8x128xf32, #tpu.memory_space<vmem>>, %arg5: memref<1x1x8x128xf32, #tpu.memory_space<vmem>>, %arg6: memref<1x1x8x128xf32, #tpu.memory_space<vmem>>) attributes {dimension_semantics = [#tpu.dimension_semantics<parallel>, #tpu.dimension_semantics<parallel>, #tpu.dimension_semantics<arbitrary>], iteration_bounds = array<i64: 2, 1, 1>, scalar_prefetch = 0 : i64, scratch_operands = 0 : i64, tpu.core_type = #tpu.core_type<tc>, window_params = [{transform_indices = @transform_0, window_bounds = array<i64: 1, 8, 128>}, {transform_indices = @transform_1, window_bounds = array<i64: 1, 8, 128>}, {transform_indices = @transform_2, window_bounds = array<i64: 1, 1, 8, 128>}, {transform_indices = @transform_3, window_bounds = array<i64: 1, 1, 8, 128>}]} {
    %c0_i32 = arith.constant 0 : i32
    %0 = arith.cmpi eq, %arg2, %c0_i32 : i32
    %1 = arith.extui %0 : i1 to i32
    %c0_i32_0 = arith.constant 0 : i32
    %2 = arith.cmpi ne, %1, %c0_i32_0 : i32
    scf.if %2 {
      %cst_24 = arith.constant 0.000000e+00 : f32
      %30 = vector.broadcast %cst_24 : f32 to vector<8x128xf32>
      %c0_25 = arith.constant 0 : index
      %c0_26 = arith.constant 0 : index
      %c0_27 = arith.constant 0 : index
      %c0_28 = arith.constant 0 : index
      %31 = vector.load %arg5[%c0_25, %c0_26, %c0_27, %c0_28] : memref<1x1x8x128xf32, #tpu.memory_space<vmem>>, vector<1x1x8x128xf32>
      %32 = vector.shape_cast %31 : vector<1x1x8x128xf32> to vector<8x128xf32>
      %33 = vector.shape_cast %30 : vector<8x128xf32> to vector<1x1x8x128xf32>
      tpu.vector_store %arg5[%c0_25, %c0_26, %c0_27, %c0_28], %33 {strides = array<i32>} : memref<1x1x8x128xf32, #tpu.memory_space<vmem>>, vector<1x1x8x128xf32>,
      %cst_29 = arith.constant 0.000000e+00 : f32
      %34 = vector.broadcast %cst_29 : f32 to vector<8x128xf32>
      %c0_30 = arith.constant 0 : index
      %c0_31 = arith.constant 0 : index
      %c0_32 = arith.constant 0 : index
      %c0_33 = arith.constant 0 : index
      %35 = vector.load %arg6[%c0_30, %c0_31, %c0_32, %c0_33] : memref<1x1x8x128xf32, #tpu.memory_space<vmem>>, vector<1x1x8x128xf32>
      %36 = vector.shape_cast %35 : vector<1x1x8x128xf32> to vector<8x128xf32>
      %37 = vector.shape_cast %34 : vector<8x128xf32> to vector<1x1x8x128xf32>
      tpu.vector_store %arg6[%c0_30, %c0_31, %c0_32, %c0_33], %37 {strides = array<i32>} : memref<1x1x8x128xf32, #tpu.memory_space<vmem>>, vector<1x1x8x128xf32>,
    } else {
    }
    %c0 = arith.constant 0 : index
    %c0_1 = arith.constant 0 : index
    %c0_2 = arith.constant 0 : index
    %3 = vector.load %arg3[%c0, %c0_1, %c0_2] : memref<1x8x128xf32, #tpu.memory_space<vmem>>, vector<1x8x128xf32>
    %4 = vector.shape_cast %3 : vector<1x8x128xf32> to vector<8x128xf32>
    %5 = arith.negf %4 : vector<8x128xf32>
    %6 = math.exp %5 : vector<8x128xf32>
    %cst = arith.constant 1.000000e+00 : f32
    %7 = vector.broadcast %cst : f32 to vector<8x128xf32>
    %8 = arith.addf %7, %6 : vector<8x128xf32>
    %9 = arith.divf %7, %8 : vector<8x128xf32>
    %c0_3 = arith.constant 0 : index
    %c0_4 = arith.constant 0 : index
    %c0_5 = arith.constant 0 : index
    %10 = vector.load %arg4[%c0_3, %c0_4, %c0_5] : memref<1x8x128xf32, #tpu.memory_space<vmem>>, vector<1x8x128xf32>
    %11 = vector.shape_cast %10 : vector<1x8x128xf32> to vector<8x128xf32>
    %12 = vector.shape_cast %9 : vector<8x128xf32> to vector<1x8x128xf32>
    %13 = vector.shape_cast %11 : vector<8x128xf32> to vector<1x8x128xf32>
    %c0_6 = arith.constant 0 : index
    %c0_7 = arith.constant 0 : index
    %c0_8 = arith.constant 0 : index
    %c0_9 = arith.constant 0 : index
    %14 = vector.load %arg5[%c0_6, %c0_7, %c0_8, %c0_9] : memref<1x1x8x128xf32, #tpu.memory_space<vmem>>, vector<1x1x8x128xf32>
    %15 = vector.shape_cast %14 : vector<1x1x8x128xf32> to vector<8x128xf32>
    %16 = arith.mulf %12, %13 : vector<1x8x128xf32>
    %cst_10 = arith.constant dense<0.000000e+00> : vector<8x128xf32>
    %17 = vector.multi_reduction <add>, %16, %cst_10 [0] : vector<1x8x128xf32> to vector<8x128xf32>
    %18 = arith.addf %15, %17 : vector<8x128xf32>
    %c0_11 = arith.constant 0 : index
    %c0_12 = arith.constant 0 : index
    %c0_13 = arith.constant 0 : index
    %c0_14 = arith.constant 0 : index
    %19 = vector.load %arg5[%c0_11, %c0_12, %c0_13, %c0_14] : memref<1x1x8x128xf32, #tpu.memory_space<vmem>>, vector<1x1x8x128xf32>
    %20 = vector.shape_cast %19 : vector<1x1x8x128xf32> to vector<8x128xf32>
    %21 = vector.shape_cast %18 : vector<8x128xf32> to vector<1x1x8x128xf32>
    tpu.vector_store %arg5[%c0_11, %c0_12, %c0_13, %c0_14], %21 {strides = array<i32>} : memref<1x1x8x128xf32, #tpu.memory_space<vmem>>, vector<1x1x8x128xf32>,
    %c0_15 = arith.constant 0 : index
    %c0_16 = arith.constant 0 : index
    %c0_17 = arith.constant 0 : index
    %c0_18 = arith.constant 0 : index
    %22 = vector.load %arg6[%c0_15, %c0_16, %c0_17, %c0_18] : memref<1x1x8x128xf32, #tpu.memory_space<vmem>>, vector<1x1x8x128xf32>
    %23 = vector.shape_cast %22 : vector<1x1x8x128xf32> to vector<8x128xf32>
    %24 = arith.addf %12, %13 : vector<1x8x128xf32>
    %cst_19 = arith.constant dense<0.000000e+00> : vector<8x128xf32>
    %25 = vector.multi_reduction <add>, %24, %cst_19 [0] : vector<1x8x128xf32> to vector<8x128xf32>
    %26 = arith.addf %23, %25 : vector<8x128xf32>
    %c0_20 = arith.constant 0 : index
    %c0_21 = arith.constant 0 : index
    %c0_22 = arith.constant 0 : index
    %c0_23 = arith.constant 0 : index
    %27 = vector.load %arg6[%c0_20, %c0_21, %c0_22, %c0_23] : memref<1x1x8x128xf32, #tpu.memory_space<vmem>>, vector<1x1x8x128xf32>
    %28 = vector.shape_cast %27 : vector<1x1x8x128xf32> to vector<8x128xf32>
    %29 = vector.shape_cast %26 : vector<8x128xf32> to vector<1x1x8x128xf32>
    tpu.vector_store %arg6[%c0_20, %c0_21, %c0_22, %c0_23], %29 {strides = array<i32>} : memref<1x1x8x128xf32, #tpu.memory_space<vmem>>, vector<1x1x8x128xf32>,
    return
  }
  func.func @transform_0(%arg0: i32, %arg1: i32, %arg2: i32) -> (i32, i32, i32) {
    %c1_i32 = arith.constant 1 : i32
    %0 = arith.muli %arg1, %c1_i32 : i32
    %1 = arith.addi %0, %arg2 : i32
    %c0_i32 = arith.constant 0 : i32
    %c0_i32_0 = arith.constant 0 : i32
    return %arg0, %1, %c0_i32 : i32, i32, i32
  }
  func.func @transform_1(%arg0: i32, %arg1: i32, %arg2: i32) -> (i32, i32, i32) {
    %c1_i32 = arith.constant 1 : i32
    %0 = arith.muli %arg1, %c1_i32 : i32
    %1 = arith.addi %0, %arg2 : i32
    %c0_i32 = arith.constant 0 : i32
    %c0_i32_0 = arith.constant 0 : i32
    return %arg0, %1, %c0_i32 : i32, i32, i32
  }
  func.func @transform_2(%arg0: i32, %arg1: i32, %arg2: i32) -> (i32, i32, i32, i32) {
    %c0_i32 = arith.constant 0 : i32
    %c0_i32_0 = arith.constant 0 : i32
    %c0_i32_1 = arith.constant 0 : i32
    return %arg0, %arg1, %c0_i32, %c0_i32_0 : i32, i32, i32, i32
  }
  func.func @transform_3(%arg0: i32, %arg1: i32, %arg2: i32) -> (i32, i32, i32, i32) {
    %c0_i32 = arith.constant 0 : i32
    %c0_i32_0 = arith.constant 0 : i32
    %c0_i32_1 = arith.constant 0 : i32
    return %arg0, %arg1, %c0_i32, %c0_i32_0 : i32, i32, i32, i32
  }
}

</mosaic_0001>

<bundles_post_ra>
// kernel: tpu_custom_call.1
= control target key start
LH: loop header
LB: loop body
LE: loop exit
PB: predicated region body
PF: predicated region fallthrough
CT: control target
= control target key end

     0   :  { %9 = vsyncpa [#allocation3], 0  ;;  %s1027_s0 = inlined_call_operand.hbm [shape: f32[2,8,128], index: 0, kind: input, shape index: {}]   ;;  %s1028_s1 = inlined_call_operand.hbm [shape: f32[2,8,128], index: 1, kind: input, shape index: {}]   ;;  %s1029_s2 = inlined_call_operand.hbm [shape: f32[2,1,8,128], index: 2, kind: output, shape index: {0}]   ;;  %s1030_s3 = inlined_call_operand.hbm [shape: f32[2,1,8,128], index: 3, kind: output, shape index: {1}]  }
   0x1   :  { %11 = vsyncpa [#allocation3 + $0x1], 0 }
   0x2   :  { %12 = vsyncpa [#allocation6], 0 }
   0x3   :  { %14 = vsyncpa [#allocation6 + $0x1], 0 }
   0x4   :  { %15 = vsyncpa [#allocation4], 0 }
   0x5   :  { %17 = vsyncpa [#allocation4 + $0x1], 0 }
   0x6   :  { %18 = vsyncpa [#allocation9], 0 }
   0x7   :  { %20 = vsyncpa [#allocation9 + $0x1], 0  ;;  %s772_s12 = smov 0   ;;  %s774_s13 = smov 0  }
   0x8   :  { %s776_s14 = smov 0   ;;  %s778_s15 = smov 0  }
   0x9   :  { %s780_s16 = smov 0   ;;  %s782_s17 = smov 0  }
   0xa LB: > { %s471_s18 = sadd.s32 4294967295, %s746_s17   ;;  %s472_s19 = sadd.s32 4294967294, %s746_s17   ;;  %s746_s17 = sphi %s782_s17, %s26_s17   ;;  %s742_s16 = sphi %s780_s16, %s1050_s16   ;;  %s738_s15 = sphi %s778_s15, %s1049_s15   ;;  %s734_s14 = sphi %s776_s14, %s1048_s14   ;;  %s730_s13 = sphi %s774_s13, %s1047_s13   ;;  %s726_s12 = sphi %s772_s12, %s1046_s12  }
   0xb   : > { %s45_s20 = sadd.s32 1, %s742_s16  ;;  %s56_s21 = sadd.s32 1, %s734_s14 }
   0xc   : > { %p47_p0 = scmp.ge.s32.totalorder %s45_s20, 2  ;;  %p63_p1 = scmp.ne.s32.totalorder %s734_s14, %s730_s13 }
   0xd   : > { %p64_p2 = scmp.eq.s32.totalorder %s746_s17, 0  ;;  %p69_p3 = scmp.ne.s32.totalorder %s730_s13, %s726_s12 }
   0xe   : > { %s1052_s20 = smov (%p47_p0, %s45_s20), 0  ;;  %p70_p5 = scmp.eq.s32.totalorder %s471_s18, 0 }
   0xf   : > { %p813_p4 = por %p64_p2, %p63_p1  ;;  %s51_s23 = ssub.s32 %s742_s16, %s1052_s20 }
  0x10   : > { %p125_p6 = scmp.eq.s32.totalorder %s471_s18, 1  ;;  %p54_p7 = scmp.eq.s32.totalorder %s51_s23, 0 }
  0x11   : > { %p819_p8 = por %p70_p5, %p69_p3  ;;  %p131_p10 = scmp.eq.s32.totalorder %s472_s19, 1 }
  0x12   : > { %p823_p9 = por %p125_p6, %p63_p1  ;;  %p513_p13 = scmp.lt.s32.totalorder %s746_s17, 2 }
  0x13   : > { %s1034_s24 = scalar_select %p819_p8, 1, 0 }
  0x14   : > { %s1035_s25 = scalar_select %p823_p9, 1, 0 }
  0x15   : > { %s828_s26 = scalar_select %p54_p7, %s734_s14, %s56_s21  }
  0x16   : > { %p830_p11 = por %p131_p10, %p69_p3  ;;  %s837_s28 = sand.u32 1, %s734_s14  }
  0x17   : > { %s475_s29 = sshll.u32 %s837_s28, 3  ;;  %s476_s30 = sshll.u32 %s742_s16, 7 }
  0x18   : > { %s1036_s27 = scalar_select %p830_p11, 1, 0 }
  0x19   : > { %s846_s6 = scalar_lea.hbm %s1027_s0, %s476_s30  ;;  %s183_s7 = scalar_lea.vmem [#allocation2], %s475_s29 }
  0x1a   : > { %s192_s8 = sshll.u32 %s183_s7, 4  ;;  %p854_p0 = pnand %p513_p13, %p813_p4  ;;  %s850_s8 = int_to_ptr.vmem [resolvable:$true] %s192_s8 }
  0x1b   : > { %s180_s10 = scalar_lea.sflag [#allocation3], %s837_s28  ;;  %s568_s11 = scalar_lea.hbm %s846_s6, 128 }
  0x1c   : > { %p569_p3 = scmp.ne.s32.totalorder %s846_s6, %s568_s11  ;;  %p570_p5 = pneg %p854_p0 }
  0x1d   : > { %s573_s21 = scalar_lea.hbm %s1027_s0, 256  ;;  %p574_p4 = scmp.lt.u32.totalorder %s846_s6, %s1027_s0 }
  0x1e   : > { %p571_p6 = pnand %p570_p5, %p569_p3  ;;  %p575_p10 = scmp.lt.u32.totalorder %s573_s21, %s568_s11 }
  0x1f   : > { %p577_p12 = scmp.lt.u32.totalorder %s568_s11, %s846_s6 }
  0x20   : > { %p572_p7 = pneg %p571_p6  ;;  %p576_p13 = por %p575_p10, %p574_p4 }
  0x22   : > { %p578_p1 = por %p577_p12, %p576_p13 }
  0x24   : > { %p579_p2 = pnand %p578_p1, %p572_p7 }
  0x26   : > { %582 = shalt.err (!%p579_p2)
}
  0x27   : > { %s583_s4 = scalar_lea.vmem %s850_s8, 128  ;;  %s748_s5 = smov [#allocation2]  }
  0x28   : > { %p584_p3 = scmp.ne.s32.totalorder %s850_s8, %s583_s4  ;;  %s588_s7 = sshll.u32 %s748_s5, 4  ;;  %s589_s7 = int_to_ptr.vmem [resolvable:$false] %s588_s7 }
  0x29   : > { %s590_s18 = scalar_lea.vmem %s589_s7, 256  ;;  %p591_p9 = scmp.lt.s32.totalorder %s850_s8, %s589_s7 }
  0x2a   : > { %p586_p6 = pnand %p584_p3, %p570_p5  ;;  %p592_p4 = scmp.lt.s32.totalorder %s590_s18, %s583_s4 }
  0x2c   : > { %p587_p11 = pneg %p586_p6  ;;  %p593_p10 = por %p592_p4, %p591_p9 }
  0x2e   : > { %p594_p12 = pnand %p593_p10, %p587_p11 }
  0x30   : > { %597 = shalt.err (!%p594_p12)
}
  0x31   : > { %502 = dma.hbm_to_vmem [thread:$0]  (!%p854_p0), %s846_s6, 128, %s850_s8, %s180_s10  }
  0x32   : > { %p1038_p1 = scmp.lt.s32.totalorder %s746_s17, 3  ;;  %p1039_p2 = scmp.ge.s32.totalorder %s746_s17, 1 }
  0x33   : > { %s899_s22 = scalar_lea.hbm %s1028_s1, %s476_s30  ;;  %s203_s23 = scalar_lea.vmem [#allocation5], %s475_s29 }
  0x34   : > { %p890_p7 = pnand %p1039_p2, %p1038_p1  ;;  %s212_s4 = sshll.u32 %s203_s23, 4  ;;  %s213_s4 = int_to_ptr.vmem [resolvable:$true] %s212_s4 }
  0x35   : > { %s200_s6 = scalar_lea.sflag [#allocation6], %s837_s28  ;;  %s598_s8 = scalar_lea.hbm %s899_s22, 128 }
  0x36   : > { %s1040_s11 = scalar_select %p890_p7, 1, 0 }
  0x37   : > { %p599_p9 = scmp.ne.s32.totalorder %s899_s22, %s598_s8  ;;  %s603_s30 = scalar_lea.hbm %s1028_s1, 256 }
  0x38   : > { %p604_p3 = scmp.lt.u32.totalorder %s899_s22, %s1028_s1  ;;  %p605_p6 = scmp.lt.u32.totalorder %s603_s30, %s598_s8 }
  0x39   : > { %p601_p11 = pnand %p599_p9, %p570_p5  ;;  %p607_p10 = scmp.lt.u32.totalorder %s598_s8, %s899_s22 }
  0x3a   : > { %p606_p4 = por %p605_p6, %p604_p3 }
  0x3b   : > { %p602_p13 = pneg %p601_p11 }
  0x3c   : > { %p608_p12 = por %p607_p10, %p606_p4 }
  0x3e   : > { %p609_p1 = pnand %p608_p12, %p602_p13 }
  0x40   : > { %612 = shalt.err (!%p609_p1)
}
  0x41   : > { %s613_s28 = scalar_lea.vmem %s213_s4, 128  ;;  %s749_s29 = smov [#allocation5]  }
  0x42   : > { %p614_p2 = scmp.ne.s32.totalorder %s213_s4, %s613_s28  ;;  %s618_s19 = sshll.u32 %s749_s29, 4  ;;  %s619_s19 = int_to_ptr.vmem [resolvable:$false] %s618_s19 }
  0x43   : > { %s620_s21 = scalar_lea.vmem %s619_s19, 256  ;;  %p621_p8 = scmp.lt.s32.totalorder %s213_s4, %s619_s19 }
  0x44   : > { %p616_p9 = pnand %p614_p2, %p570_p5  ;;  %p622_p7 = scmp.lt.s32.totalorder %s620_s21, %s613_s28 }
  0x46   : > { %p617_p11 = pneg %p616_p9  ;;  %p623_p3 = por %p622_p7, %p621_p8 }
  0x48   : > { %p624_p6 = pnand %p623_p3, %p617_p11 }
  0x4a   : > { %627 = shalt.err (!%p624_p6)
}
  0x4b   : > { %505 = dma.hbm_to_vmem [thread:$0]  (!%p854_p0), %s899_s22, 128, %s213_s4, %s200_s6  }
  0x4c   : > { %p1041_p13 = scmp.ne.s32.totalorder %s1040_s11, 0 }
  0x4d   : > { %s926_s23 = sand.u32 (!%p1041_p13), 1, %s730_s13   ;;  %p1042_p8 = scmp.ne.s32.totalorder (!%p1041_p13), %s1034_s24, 0 }
  0x4e   : > { %221 = sbr.rel (%p1041_p13) target bundleno = 154 (0x9a), region = 28  ;;  %s929_s8 = sshll.u32 (!%p1041_p13), %s926_s23, 3 }
  0x4f   : > { %s224_s10 = scalar_lea.sflag (!%p1041_p13), [#allocation3], %s926_s23  ;;  %s227_s5 = scalar_lea.vmem (!%p1041_p13), [#allocation2], %s929_s8 }
  0x55   : > { %709 = dma.done.wait (%p1042_p8), %s224_s10, 128  }
  0x56   : > { %711 = vsyncadd (%p1042_p8), %s224_s10, 4294967168  ;;  %s233_s9 = scalar_lea.sflag [#allocation6], %s926_s23  ;;  %s236_s11 = scalar_lea.vmem [#allocation5], %s929_s8 }
  0x57   : > { %713 = dma.done.wait (%p1042_p8), %s233_s9, 128  }
  0x58   : > { %715 = vsyncadd (%p1042_p8), %s233_s9, 4294967168  ;;  %v277_v0 = vld [vmem:[%s227_s5] sm:$0xff]  ;;  %v284_v4 = vld [vmem:[%s236_s11] sm:$0xff]  ;;  %s487_s22 = sshll.u32 %s738_s15, 7  ;;  %s261_s4 = scalar_lea.vmem [#allocation7], %s929_s8 }
  0x59   : > { %v484_v1 = vmul.f32 -1.442695, %v277_v0  ;;  %s315_s6 = sshll.u32 %s261_s4, 4  ;;  %s268_s24 = scalar_lea.vmem [#allocation8], %s929_s8  ;;  %s951_s6 = int_to_ptr.vmem [resolvable:$true] %s315_s6 }
  0x5a   : > { %s329_s30 = sshll.u32 %s268_s24, 4  ;;  %s949_s28 = scalar_lea.hbm %s1029_s2, %s487_s22  ;;  %s958_s30 = int_to_ptr.vmem [resolvable:$true] %s329_s30 }
  0x5b   : > { %564 = vpow2.f32 %v484_v1  ;;  %s956_s15 = scalar_lea.hbm %s1030_s3, %s487_s22  ;;  %s296_s21 = scalar_lea.sflag [#allocation4], %s926_s23 }
  0x5c   : > { %s628_s8 = scalar_lea.vmem %s951_s6, 128  ;;  %p1043_p5 = scmp.ne.s32.totalorder %s1035_s25, 0 }
  0x5d   : > { %p629_p0 = scmp.ne.s32.totalorder %s951_s6, %s628_s8  ;;  %s750_s10 = smov [#allocation7]  }
  0x5e   : > { %s632_s5 = sshll.u32 %s750_s10, 4  ;;  %s633_s5 = int_to_ptr.vmem [resolvable:$false] %s632_s5 }
  0x5f   : > { %p630_p7 = pnand %p629_p0, %p1043_p5  ;;  %s634_s9 = scalar_lea.vmem %s633_s5, 256 }
  0x60   : > { %p635_p10 = scmp.lt.s32.totalorder %s951_s6, %s633_s5  ;;  %p636_p12 = scmp.lt.s32.totalorder %s634_s9, %s628_s8 }
  0x61   : > { %p631_p4 = pneg %p630_p7 }
  0x62   : > { %p637_p1 = por %p636_p12, %p635_p10 }
  0x64   : > { %p638_p2 = pnand %p637_p1, %p631_p4 }
  0x65   : > { %v565_v2 = vpop.eup %564 }
  0x66   : > { %v281_v3 = vadd.f32 1.0, %v565_v2 }
  0x68   : > { %566 = vrcp.f32 %v281_v3 }
  0x72   : > { %v567_v5 = vpop.eup %566 }
  0x73   : > { %v286_v6 = vmul.f32 %v567_v5, %v284_v4  ;;  %v291_v7 = vadd.f32 %v567_v5, %v284_v4 }
  0x75   : > { %289 = vst [vmem:[%s261_s4] sm:$0xff] %v286_v6  ;;  %294 = vst [vmem:[%s268_s24] sm:$0xff] %v291_v7 }
  0x76   : > { %641 = shalt.err (!%p638_p2)
}
  0x77   : > { %s642_s11 = scalar_lea.hbm %s949_s28, 128  ;;  %s646_s24 = scalar_lea.hbm %s1029_s2, 256 }
  0x78   : > { %p643_p9 = scmp.ne.s32.totalorder %s949_s28, %s642_s11  ;;  %p647_p6 = scmp.lt.u32.totalorder %s949_s28, %s1029_s2 }
  0x79   : > { %p648_p13 = scmp.lt.u32.totalorder %s646_s24, %s642_s11  ;;  %p650_p0 = scmp.lt.u32.totalorder %s642_s11, %s949_s28 }
  0x7a   : > { %p644_p11 = pnand %p643_p9, %p1043_p5 }
  0x7b   : > { %p649_p8 = por %p648_p13, %p647_p6 }
  0x7c   : > { %p645_p3 = pneg %p644_p11 }
  0x7d   : > { %p651_p7 = por %p650_p0, %p649_p8 }
  0x7f   : > { %p652_p4 = pnand %p651_p7, %p645_p3 }
  0x81   : > { %655 = shalt.err (!%p652_p4)
}
  0x82   : > { %495 = dma.vmem_to_hbm [thread:$0]  (%p1043_p5), %s951_s6, 128, %s949_s28, %s296_s21  }
  0x83   : > { %s301_s29 = scalar_lea.sflag [#allocation9], %s926_s23  ;;  %s656_s19 = scalar_lea.vmem %s958_s30, 128 }
  0x84   : > { %p657_p10 = scmp.ne.s32.totalorder %s958_s30, %s656_s19  ;;  %s751_s8 = smov [#allocation8]  }
  0x85   : > { %s660_s10 = sshll.u32 %s751_s8, 4  ;;  %s661_s10 = int_to_ptr.vmem [resolvable:$false] %s660_s10 }
  0x86   : > { %p658_p12 = pnand %p657_p10, %p1043_p5  ;;  %s662_s5 = scalar_lea.vmem %s661_s10, 256 }
  0x87   : > { %p663_p2 = scmp.lt.s32.totalorder %s958_s30, %s661_s10  ;;  %p664_p9 = scmp.lt.s32.totalorder %s662_s5, %s656_s19 }
  0x88   : > { %p659_p1 = pneg %p658_p12 }
  0x89   : > { %p665_p11 = por %p664_p9, %p663_p2 }
  0x8b   : > { %p666_p3 = pnand %p665_p11, %p659_p1 }
  0x8d   : > { %669 = shalt.err (!%p666_p3)
}
  0x8e   : > { %s670_s23 = scalar_lea.hbm %s956_s15, 128  ;;  %s674_s21 = scalar_lea.hbm %s1030_s3, 256 }
  0x8f   : > { %p671_p6 = scmp.ne.s32.totalorder %s956_s15, %s670_s23  ;;  %p675_p0 = scmp.lt.u32.totalorder %s956_s15, %s1030_s3 }
  0x90   : > { %p676_p7 = scmp.lt.u32.totalorder %s674_s21, %s670_s23  ;;  %p678_p10 = scmp.lt.u32.totalorder %s670_s23, %s956_s15 }
  0x91   : > { %p672_p13 = pnand %p671_p6, %p1043_p5 }
  0x92   : > { %p677_p4 = por %p676_p7, %p675_p0 }
  0x93   : > { %p673_p8 = pneg %p672_p13 }
  0x94   : > { %p679_p12 = por %p678_p10, %p677_p4 }
  0x96   : > { %p680_p1 = pnand %p679_p12, %p673_p8 }
  0x98   : > { %683 = shalt.err (!%p680_p1)
}
  0x99   : > { %496 = dma.vmem_to_hbm [thread:$0]  (%p1043_p5), %s958_s30, 128, %s956_s15, %s301_s29  }
  0x9a PF: > { %s341_s22 = sand.u32 1, %s726_s12   ;;  %p1044_p2 = scmp.ne.s32.totalorder %s1036_s27, 0 }
  0x9b   : > { %p1045_p9 = scmp.ge.s32.totalorder %s746_s17, 2  ;;  %s342_s4 = scalar_lea.sflag [#allocation4], %s341_s22 }
  0x9d   : > { %p507_p11 = pnand %p1045_p9, %p1044_p2 }
  0x9f   : > { %717 = dma.done.wait (!%p507_p11), %s342_s4, 128  }
  0xa0   : > { %719 = vsyncadd (!%p507_p11), %s342_s4, 4294967168  ;;  %s351_s24 = scalar_lea.sflag [#allocation9], %s341_s22 }
  0xa1   : > { %721 = dma.done.wait (!%p507_p11), %s351_s24, 128  }
  0xa2   : > { %723 = vsyncadd (!%p507_p11), %s351_s24, 4294967168  ;;  %s26_s17 = sadd.s32 1, %s746_s17   ;;  %s1046_s12 = smov %s730_s13 }
  0xa3   : > { %p23_p3 = scmp.ge.s32.totalorder %s26_s17, 4   ;;  %s1047_s13 = smov %s734_s14 }
  0xa4   : > { %s1048_s14 = smov %s828_s26  ;;  %s1049_s15 = smov %s742_s16 }
  0xa5   : > { %s1050_s16 = smov %s1052_s20  ;;  %25 = sbr.rel (!%p23_p3) target bundleno = 10 (0xa), region = 107 }
  0xac   :  { %356 = vsyncpa [#allocation3], 1 }
  0xad   :  { %358 = vsyncpa [#allocation3 + $0x1], 1 }
  0xae   :  { %359 = vsyncpa [#allocation6], 1 }
  0xaf   :  { %361 = vsyncpa [#allocation6 + $0x1], 1 }
  0xb0   :  { %362 = vsyncpa [#allocation4], 1 }
  0xb1   :  { %364 = vsyncpa [#allocation4 + $0x1], 1 }
  0xb2   :  { %365 = vsyncpa [#allocation9], 1 }
  0xb3   :  { %367 = vsyncpa [#allocation9 + $0x1], 1 }

</bundles_post_ra>
